<compile_context>
chip_gen: v6e
topology: v6e:2x2x1
jax: 0.10.0
libtpu: 0.0.40
codegen_flags: <defaults>
</compile_context>

<pallas_src>
import jax
import jax.numpy as jnp
from jax.experimental import pallas as pl
from jax.experimental.pallas import tpu as pltpu

BN_EPS = 1e-5
CONV_OUT = 2  # fixed by the module definition


def policy_kernel(x_ref, convw_ref, convb_ref, gamma_ref, beta_ref,
                  lnw_ref, lnb_ref, out_ref, feat_ref):
    # x_ref:     VMEM (N, C, HW)         f32       (same block every grid step)
    # convw_ref: SMEM (2, C)             f32       (1x1 conv weights)
    # convb_ref: SMEM (2,)               f32       (conv bias)
    # gamma_ref: SMEM (2,)               f32       (BN weight)
    # beta_ref:  SMEM (2,)               f32       (BN bias)
    # lnw_ref:   VMEM (tn, 2*HW)         f32/bf16  (Linear weight rows, tile j)
    # lnb_ref:   VMEM (1, tn)            f32
    # out_ref:   VMEM (N, tn)            f32
    # feat_ref:  VMEM scratch (N, 2*HW)  f32/bf16  (conv+BN+ReLU, persistent)
    HW = x_ref.shape[-1]

    @pl.when(pl.program_id(0) == 0)
    def _():
        x = x_ref[...]                                   # (N, C, HW)
        n, c_in, _ = x.shape
        inv_count = 1.0 / (n * HW)
        for oc in range(CONV_OUT):
            # 1x1 conv == per-channel weighted sum (pure VPU work).
            y = convw_ref[oc, 0] * x[:, 0, :]
            for c in range(1, c_in):
                y = y + convw_ref[oc, c] * x[:, c, :]
            y = y + convb_ref[oc]

            # Train-mode BatchNorm, single pass: sum & sum-of-squares, then
            # fold mean/var/gamma/beta into one affine, fused with the ReLU.
            s = jnp.sum(y)
            ss = jnp.sum(y * y)
            mean = s * inv_count
            var = ss * inv_count - mean * mean
            scale = gamma_ref[oc] * jax.lax.rsqrt(var + BN_EPS)
            shift = beta_ref[oc] - mean * scale
            feat_ref[:, oc * HW:(oc + 1) * HW] = jnp.maximum(
                y * scale + shift, 0.0).astype(feat_ref.dtype)

    # Linear tile: out[:, tile] = feat @ w_tile.T + b_tile.  The weight keeps
    # its PyTorch (out, in) layout; contract on the last axis of both operands
    # so no transpose is ever materialized in HBM.
    acc = jax.lax.dot_general(
        feat_ref[...], lnw_ref[...],
        dimension_numbers=(((1,), (1,)), ((), ())),
        preferred_element_type=jnp.float32)
    out_ref[...] = acc + lnb_ref[...]


def _pick_col_tile(HW, N, C, w_bytes, budget_bytes=20 * 1024 * 1024):
    """Largest output-column tile (multiple of 128, dividing HW) whose VMEM
    footprint stays well inside the default scoped-VMEM limit (v7x-safe)."""
    if HW % 128 != 0:
        return HW  # tiny spatial dims: single full-width tile
    for tn in range(HW, 127, -128):
        if HW % tn:
            continue
        need = (N * C * HW * 4                       # x block (resident)
                + N * CONV_OUT * HW * w_bytes        # feat scratch
                + 2 * tn * CONV_OUT * HW * w_bytes   # ln_w tile, double-buffered
                + 2 * tn * 4                         # ln_b tile, double-buffered
                + 2 * N * tn * 4)                    # out tile, double-buffered
        if need <= budget_bytes:
            return tn
    return 128


def policy_forward(x_nchw, conv_w, conv_b, bn_gamma, bn_beta, ln_w, ln_b,
                   *, col_tile=None):
    """Forward pass of `Policy`.

    x_nchw: (N, C, H, W); conv_w: (2, C, 1, 1); conv_b: (2,);
    bn_gamma/bn_beta: (2,); ln_w: (H*W, 2*H*W) in PyTorch (out, in) layout,
    float32 or bfloat16; ln_b: (H*W,).  Returns (N, H*W) float32.
    BatchNorm uses batch statistics (PyTorch module default: training mode).
    """
    N, C, H, W = x_nchw.shape
    HW = H * W
    assert ln_w.shape == (HW, CONV_OUT * HW)
    assert ln_w.dtype.name in ("float32", "bfloat16")

    x_flat = x_nchw.reshape(N, C, HW).astype(jnp.float32)   # layout no-op
    convw2d = conv_w.reshape(CONV_OUT, C).astype(jnp.float32)
    lnb2d = ln_b.reshape(1, HW).astype(jnp.float32)

    w_bytes = ln_w.dtype.itemsize
    tn = col_tile if col_tile is not None else _pick_col_tile(HW, N, C, w_bytes)
    assert HW % tn == 0 and (tn % 128 == 0 or tn == HW)
    grid = (HW // tn,)

    smem = pl.BlockSpec(memory_space=pltpu.MemorySpace.SMEM)

    cost = pl.CostEstimate(
        flops=2 * N * (CONV_OUT * HW) * HW + 2 * N * C * CONV_OUT * HW,
        transcendentals=CONV_OUT,
        bytes_accessed=(x_flat.size * 4 + ln_w.size * w_bytes
                        + lnb2d.size * 4 + N * HW * 4),
    )

    return pl.pallas_call(
        policy_kernel,
        out_shape=jax.ShapeDtypeStruct((N, HW), jnp.float32),
        grid=grid,
        in_specs=[
            pl.BlockSpec((N, C, HW), lambda j: (0, 0, 0)),        # x (resident)
            smem,                                                 # conv weights
            smem,                                                 # conv bias
            smem,                                                 # BN gamma
            smem,                                                 # BN beta
            pl.BlockSpec((tn, CONV_OUT * HW), lambda j: (j, 0)),  # ln_w rows
            pl.BlockSpec((1, tn), lambda j: (0, j)),              # ln_b cols
        ],
        out_specs=pl.BlockSpec((N, tn), lambda j: (0, j)),
        scratch_shapes=[pltpu.VMEM((N, CONV_OUT * HW), ln_w.dtype)],
        compiler_params=pltpu.CompilerParams(
            dimension_semantics=("arbitrary",)),  # scratch carried across j
        cost_estimate=cost,
    )(x_flat, convw2d, conv_b.astype(jnp.float32),
      bn_gamma.astype(jnp.float32), bn_beta.astype(jnp.float32), ln_w, lnb2d)


def policy_reference(x_nchw, conv_w, conv_b, bn_gamma, bn_beta, ln_w, ln_b):
    """Pure-JAX reference mirroring the PyTorch forward (train-mode BN)."""
    N, C, H, W = x_nchw.shape
    y = jnp.einsum('nchw,oc->nohw', x_nchw, conv_w.reshape(CONV_OUT, C))
    y = y + conv_b[None, :, None, None]
    mean = jnp.mean(y, axis=(0, 2, 3), keepdims=True)
    var = jnp.mean((y - mean) ** 2, axis=(0, 2, 3), keepdims=True)
    y = (y - mean) / jnp.sqrt(var + BN_EPS)
    y = y * bn_gamma[None, :, None, None] + bn_beta[None, :, None, None]
    y = jnp.maximum(y, 0.0).reshape(N, CONV_OUT * H * W)
    return y @ ln_w.astype(jnp.float32).T + ln_b


if __name__ == "__main__":
    # Small shapes consistent with the module
    N, C, H, W = 2, 4, 16, 16
    HW = H * W

    key = jax.random.PRNGKey(0)
    kx, kcw, kcb, klw, klb = jax.random.split(key, 5)

    x = jax.random.normal(kx, (N, C, H, W), dtype=jnp.float32)

    # Synthetic parameters (shapes match nn.Conv2d / nn.BatchNorm2d / nn.Linear).
    conv_w = 0.1 * jax.random.normal(kcw, (CONV_OUT, C, 1, 1), dtype=jnp.float32)
    conv_b = 0.1 * jax.random.normal(kcb, (CONV_OUT,), dtype=jnp.float32)
    bn_gamma = jnp.ones((CONV_OUT,), dtype=jnp.float32)   # PyTorch BN defaults
    bn_beta = jnp.zeros((CONV_OUT,), dtype=jnp.float32)
    ln_w = 0.05 * jax.random.normal(klw, (HW, CONV_OUT * HW), dtype=jnp.float32)
    ln_b = 0.05 * jax.random.normal(klb, (HW,), dtype=jnp.float32)

    ref = policy_reference(x, conv_w, conv_b, bn_gamma, bn_beta, ln_w, ln_b)

    # 1) f32 weights, auto tile (single full-width output tile at these shapes).
    out = jax.block_until_ready(
        policy_forward(x, conv_w, conv_b, bn_gamma, bn_beta, ln_w, ln_b))
    assert out.shape == (N, HW)
    assert jnp.allclose(out, ref, atol=1e-3, rtol=1e-3), "f32 mismatch"

    # 2) bf16 Linear weight + forced 128-wide output-column tiles: exercises
    #    the streamed-weight / persistent-scratch multi-tile path (used when
    #    H*W is large, e.g. on v7x's smaller VMEM) and the halved-weight-DMA
    #    fast path.  f32 accumulation on the MXU.
    ln_w_bf16 = ln_w.astype(jnp.bfloat16)
    out_bf16 = jax.block_until_ready(
        policy_forward(x, conv_w, conv_b, bn_gamma, bn_beta, ln_w_bf16, ln_b,
                       col_tile=128))
    assert jnp.allclose(out_bf16, ref, atol=2e-2, rtol=2e-2), "bf16/tiled mismatch"

    print("KERNEL_OK")
</pallas_src>

<mosaic_0001>
module attributes {stable_mosaic.version = 11 : i64} {
  func.func @policy_kernel(%arg0: i32, %arg1: memref<2x4x256xf32, #tpu.memory_space<vmem>>, %arg2: memref<2x4xf32, #tpu.memory_space<smem>>, %arg3: memref<2xf32, #tpu.memory_space<smem>>, %arg4: memref<2xf32, #tpu.memory_space<smem>>, %arg5: memref<2xf32, #tpu.memory_space<smem>>, %arg6: memref<256x512xf32, #tpu.memory_space<vmem>>, %arg7: memref<1x256xf32, #tpu.memory_space<vmem>>, %arg8: memref<2x256xf32, #tpu.memory_space<vmem>>, %arg9: memref<2x512xf32, #tpu.memory_space<vmem>>) attributes {dimension_semantics = [#tpu.dimension_semantics<arbitrary>], iteration_bounds = array<i64: 1>, scalar_prefetch = 0 : i64, scratch_operands = 1 : i64, tpu.core_type = #tpu.core_type<tc>, window_params = [{pipeline_mode = #tpu.pipeline_mode<synchronous>, transform_indices = @transform_0, window_bounds = array<i64: 2, 4, 256>}, {transform_indices = @transform_1, window_bounds = array<i64: 2, 4>}, {transform_indices = @transform_2, window_bounds = array<i64: 2>}, {transform_indices = @transform_3, window_bounds = array<i64: 2>}, {transform_indices = @transform_4, window_bounds = array<i64: 2>}, {transform_indices = @transform_5, window_bounds = array<i64: 256, 512>}, {transform_indices = @transform_6, window_bounds = array<i64: 1, 256>}, {transform_indices = @transform_7, window_bounds = array<i64: 2, 256>}]} {
    %c0_i32 = arith.constant 0 : i32
    %0 = arith.cmpi eq, %arg0, %c0_i32 : i32
    %1 = arith.extui %0 : i1 to i32
    %c0_i32_0 = arith.constant 0 : i32
    %2 = arith.cmpi ne, %1, %c0_i32_0 : i32
    scf.if %2 {
      %c0_8 = arith.constant 0 : index
      %c0_9 = arith.constant 0 : index
      %c0_10 = arith.constant 0 : index
      %10 = vector.load %arg1[%c0_8, %c0_9, %c0_10] : memref<2x4x256xf32, #tpu.memory_space<vmem>>, vector<2x4x256xf32>
      %c0_11 = arith.constant 0 : index
      %c0_12 = arith.constant 0 : index
      %11 = memref.load %arg2[%c0_11, %c0_12] : memref<2x4xf32, #tpu.memory_space<smem>>
      %12 = vector.extract_strided_slice %10 {offsets = [0, 0, 0], sizes = [2, 1, 256], strides = [1, 1, 1]} : vector<2x4x256xf32> to vector<2x1x256xf32>
      %13 = vector.shape_cast %12 : vector<2x1x256xf32> to vector<2x256xf32>
      %14 = vector.broadcast %11 : f32 to vector<2x256xf32>
      %15 = arith.mulf %14, %13 : vector<2x256xf32>
      %c0_13 = arith.constant 0 : index
      %c1 = arith.constant 1 : index
      %16 = memref.load %arg2[%c0_13, %c1] : memref<2x4xf32, #tpu.memory_space<smem>>
      %17 = vector.extract_strided_slice %10 {offsets = [0, 1, 0], sizes = [2, 1, 256], strides = [1, 1, 1]} : vector<2x4x256xf32> to vector<2x1x256xf32>
      %18 = vector.shape_cast %17 : vector<2x1x256xf32> to vector<2x256xf32>
      %19 = vector.broadcast %16 : f32 to vector<2x256xf32>
      %20 = arith.mulf %19, %18 : vector<2x256xf32>
      %21 = arith.addf %15, %20 : vector<2x256xf32>
      %c0_14 = arith.constant 0 : index
      %c2 = arith.constant 2 : index
      %22 = memref.load %arg2[%c0_14, %c2] : memref<2x4xf32, #tpu.memory_space<smem>>
      %23 = vector.extract_strided_slice %10 {offsets = [0, 2, 0], sizes = [2, 1, 256], strides = [1, 1, 1]} : vector<2x4x256xf32> to vector<2x1x256xf32>
      %24 = vector.shape_cast %23 : vector<2x1x256xf32> to vector<2x256xf32>
      %25 = vector.broadcast %22 : f32 to vector<2x256xf32>
      %26 = arith.mulf %25, %24 : vector<2x256xf32>
      %27 = arith.addf %21, %26 : vector<2x256xf32>
      %c0_15 = arith.constant 0 : index
      %c3 = arith.constant 3 : index
      %28 = memref.load %arg2[%c0_15, %c3] : memref<2x4xf32, #tpu.memory_space<smem>>
      %29 = vector.extract_strided_slice %10 {offsets = [0, 3, 0], sizes = [2, 1, 256], strides = [1, 1, 1]} : vector<2x4x256xf32> to vector<2x1x256xf32>
      %30 = vector.shape_cast %29 : vector<2x1x256xf32> to vector<2x256xf32>
      %31 = vector.broadcast %28 : f32 to vector<2x256xf32>
      %32 = arith.mulf %31, %30 : vector<2x256xf32>
      %33 = arith.addf %27, %32 : vector<2x256xf32>
      %c0_16 = arith.constant 0 : index
      %34 = memref.load %arg3[%c0_16] : memref<2xf32, #tpu.memory_space<smem>>
      %35 = vector.broadcast %34 : f32 to vector<2x256xf32>
      %36 = arith.addf %33, %35 : vector<2x256xf32>
      %37 = vector.shape_cast %36 : vector<2x256xf32> to vector<1x2x256xf32>
      %cst_17 = arith.constant dense<0.000000e+00> : vector<1xf32>
      %38 = vector.multi_reduction <add>, %37, %cst_17 [1, 2] : vector<1x2x256xf32> to vector<1xf32>
      %39 = vector.shape_cast %38 : vector<1xf32> to vector<1x1x1xf32>
      %40 = vector.extract %39[0, 0, 0] : f32 from vector<1x1x1xf32>
      %41 = arith.mulf %36, %36 : vector<2x256xf32>
      %42 = vector.shape_cast %41 : vector<2x256xf32> to vector<1x2x256xf32>
      %cst_18 = arith.constant dense<0.000000e+00> : vector<1xf32>
      %43 = vector.multi_reduction <add>, %42, %cst_18 [1, 2] : vector<1x2x256xf32> to vector<1xf32>
      %44 = vector.shape_cast %43 : vector<1xf32> to vector<1x1x1xf32>
      %45 = vector.extract %44[0, 0, 0] : f32 from vector<1x1x1xf32>
      %cst_19 = arith.constant 0.001953125 : f32
      %46 = arith.mulf %40, %cst_19 : f32
      %cst_20 = arith.constant 0.001953125 : f32
      %47 = arith.mulf %45, %cst_20 : f32
      %48 = arith.mulf %46, %46 : f32
      %49 = arith.subf %47, %48 : f32
      %c0_21 = arith.constant 0 : index
      %50 = memref.load %arg4[%c0_21] : memref<2xf32, #tpu.memory_space<smem>>
      %cst_22 = arith.constant 9.99999974E-6 : f32
      %51 = arith.addf %49, %cst_22 : f32
      %52 = math.rsqrt %51 : f32
      %53 = arith.mulf %50, %52 : f32
      %c0_23 = arith.constant 0 : index
      %54 = memref.load %arg5[%c0_23] : memref<2xf32, #tpu.memory_space<smem>>
      %55 = arith.mulf %46, %53 : f32
      %56 = arith.subf %54, %55 : f32
      %57 = vector.broadcast %53 : f32 to vector<2x256xf32>
      %58 = arith.mulf %36, %57 : vector<2x256xf32>
      %59 = vector.broadcast %56 : f32 to vector<2x256xf32>
      %60 = arith.addf %58, %59 : vector<2x256xf32>
      %cst_24 = arith.constant 0.000000e+00 : f32
      %61 = vector.broadcast %cst_24 : f32 to vector<2x256xf32>
      %62 = arith.maximumf %60, %61 : vector<2x256xf32>
      %c0_25 = arith.constant 0 : index
      %c0_26 = arith.constant 0 : index
      %63 = vector.load %arg9[%c0_25, %c0_26] : memref<2x512xf32, #tpu.memory_space<vmem>>, vector<2x256xf32>
      tpu.vector_store %arg9[%c0_25, %c0_26], %62 {strides = array<i32>} : memref<2x512xf32, #tpu.memory_space<vmem>>, vector<2x256xf32>,
      %c1_27 = arith.constant 1 : index
      %c0_28 = arith.constant 0 : index
      %64 = memref.load %arg2[%c1_27, %c0_28] : memref<2x4xf32, #tpu.memory_space<smem>>
      %65 = vector.extract_strided_slice %10 {offsets = [0, 0, 0], sizes = [2, 1, 256], strides = [1, 1, 1]} : vector<2x4x256xf32> to vector<2x1x256xf32>
      %66 = vector.shape_cast %65 : vector<2x1x256xf32> to vector<2x256xf32>
      %67 = vector.broadcast %64 : f32 to vector<2x256xf32>
      %68 = arith.mulf %67, %66 : vector<2x256xf32>
      %c1_29 = arith.constant 1 : index
      %c1_30 = arith.constant 1 : index
      %69 = memref.load %arg2[%c1_29, %c1_30] : memref<2x4xf32, #tpu.memory_space<smem>>
      %70 = vector.extract_strided_slice %10 {offsets = [0, 1, 0], sizes = [2, 1, 256], strides = [1, 1, 1]} : vector<2x4x256xf32> to vector<2x1x256xf32>
      %71 = vector.shape_cast %70 : vector<2x1x256xf32> to vector<2x256xf32>
      %72 = vector.broadcast %69 : f32 to vector<2x256xf32>
      %73 = arith.mulf %72, %71 : vector<2x256xf32>
      %74 = arith.addf %68, %73 : vector<2x256xf32>
      %c1_31 = arith.constant 1 : index
      %c2_32 = arith.constant 2 : index
      %75 = memref.load %arg2[%c1_31, %c2_32] : memref<2x4xf32, #tpu.memory_space<smem>>
      %76 = vector.extract_strided_slice %10 {offsets = [0, 2, 0], sizes = [2, 1, 256], strides = [1, 1, 1]} : vector<2x4x256xf32> to vector<2x1x256xf32>
      %77 = vector.shape_cast %76 : vector<2x1x256xf32> to vector<2x256xf32>
      %78 = vector.broadcast %75 : f32 to vector<2x256xf32>
      %79 = arith.mulf %78, %77 : vector<2x256xf32>
      %80 = arith.addf %74, %79 : vector<2x256xf32>
      %c1_33 = arith.constant 1 : index
      %c3_34 = arith.constant 3 : index
      %81 = memref.load %arg2[%c1_33, %c3_34] : memref<2x4xf32, #tpu.memory_space<smem>>
      %82 = vector.extract_strided_slice %10 {offsets = [0, 3, 0], sizes = [2, 1, 256], strides = [1, 1, 1]} : vector<2x4x256xf32> to vector<2x1x256xf32>
      %83 = vector.shape_cast %82 : vector<2x1x256xf32> to vector<2x256xf32>
      %84 = vector.broadcast %81 : f32 to vector<2x256xf32>
      %85 = arith.mulf %84, %83 : vector<2x256xf32>
      %86 = arith.addf %80, %85 : vector<2x256xf32>
      %c1_35 = arith.constant 1 : index
      %87 = memref.load %arg3[%c1_35] : memref<2xf32, #tpu.memory_space<smem>>
      %88 = vector.broadcast %87 : f32 to vector<2x256xf32>
      %89 = arith.addf %86, %88 : vector<2x256xf32>
      %90 = vector.shape_cast %89 : vector<2x256xf32> to vector<1x2x256xf32>
      %cst_36 = arith.constant dense<0.000000e+00> : vector<1xf32>
      %91 = vector.multi_reduction <add>, %90, %cst_36 [1, 2] : vector<1x2x256xf32> to vector<1xf32>
      %92 = vector.shape_cast %91 : vector<1xf32> to vector<1x1x1xf32>
      %93 = vector.extract %92[0, 0, 0] : f32 from vector<1x1x1xf32>
      %94 = arith.mulf %89, %89 : vector<2x256xf32>
      %95 = vector.shape_cast %94 : vector<2x256xf32> to vector<1x2x256xf32>
      %cst_37 = arith.constant dense<0.000000e+00> : vector<1xf32>
      %96 = vector.multi_reduction <add>, %95, %cst_37 [1, 2] : vector<1x2x256xf32> to vector<1xf32>
      %97 = vector.shape_cast %96 : vector<1xf32> to vector<1x1x1xf32>
      %98 = vector.extract %97[0, 0, 0] : f32 from vector<1x1x1xf32>
      %cst_38 = arith.constant 0.001953125 : f32
      %99 = arith.mulf %93, %cst_38 : f32
      %cst_39 = arith.constant 0.001953125 : f32
      %100 = arith.mulf %98, %cst_39 : f32
      %101 = arith.mulf %99, %99 : f32
      %102 = arith.subf %100, %101 : f32
      %c1_40 = arith.constant 1 : index
      %103 = memref.load %arg4[%c1_40] : memref<2xf32, #tpu.memory_space<smem>>
      %cst_41 = arith.constant 9.99999974E-6 : f32
      %104 = arith.addf %102, %cst_41 : f32
      %105 = math.rsqrt %104 : f32
      %106 = arith.mulf %103, %105 : f32
      %c1_42 = arith.constant 1 : index
      %107 = memref.load %arg5[%c1_42] : memref<2xf32, #tpu.memory_space<smem>>
      %108 = arith.mulf %99, %106 : f32
      %109 = arith.subf %107, %108 : f32
      %110 = vector.broadcast %106 : f32 to vector<2x256xf32>
      %111 = arith.mulf %89, %110 : vector<2x256xf32>
      %112 = vector.broadcast %109 : f32 to vector<2x256xf32>
      %113 = arith.addf %111, %112 : vector<2x256xf32>
      %cst_43 = arith.constant 0.000000e+00 : f32
      %114 = vector.broadcast %cst_43 : f32 to vector<2x256xf32>
      %115 = arith.maximumf %113, %114 : vector<2x256xf32>
      %c0_44 = arith.constant 0 : index
      %c256 = arith.constant 256 : index
      %116 = vector.load %arg9[%c0_44, %c256] : memref<2x512xf32, #tpu.memory_space<vmem>>, vector<2x256xf32>
      tpu.vector_store %arg9[%c0_44, %c256], %115 {strides = array<i32>} : memref<2x512xf32, #tpu.memory_space<vmem>>, vector<2x256xf32>,
    } else {
    }
    %c0 = arith.constant 0 : index
    %c0_1 = arith.constant 0 : index
    %3 = vector.load %arg9[%c0, %c0_1] : memref<2x512xf32, #tpu.memory_space<vmem>>, vector<2x512xf32>
    %c0_2 = arith.constant 0 : index
    %c0_3 = arith.constant 0 : index
    %4 = vector.load %arg6[%c0_2, %c0_3] : memref<256x512xf32, #tpu.memory_space<vmem>>, vector<256x512xf32>
    %cst = arith.constant dense<0.000000e+00> : vector<2x256xf32>
    %5 = tpu.matmul %3, %4, %cst {dimension_numbers = #tpu.dot_dimension_numbers<[1], [1], [0], [0], [0, 0, 1, 0], [], []>} : vector<2x512xf32>, vector<256x512xf32>, vector<2x256xf32> -> vector<2x256xf32>
    %c0_4 = arith.constant 0 : index
    %c0_5 = arith.constant 0 : index
    %6 = vector.load %arg7[%c0_4, %c0_5] : memref<1x256xf32, #tpu.memory_space<vmem>>, vector<1x256xf32>
    %7 = vector.broadcast %6 : vector<1x256xf32> to vector<2x256xf32>
    %8 = arith.addf %5, %7 : vector<2x256xf32>
    %c0_6 = arith.constant 0 : index
    %c0_7 = arith.constant 0 : index
    %9 = vector.load %arg8[%c0_6, %c0_7] : memref<2x256xf32, #tpu.memory_space<vmem>>, vector<2x256xf32>
    tpu.vector_store %arg8[%c0_6, %c0_7], %8 {strides = array<i32>} : memref<2x256xf32, #tpu.memory_space<vmem>>, vector<2x256xf32>,
    return
  }
  func.func @transform_0(%arg0: i32) -> (i32, i32, i32) {
    %c0_i32 = arith.constant 0 : i32
    %c0_i32_0 = arith.constant 0 : i32
    %c0_i32_1 = arith.constant 0 : i32
    %c0_i32_2 = arith.constant 0 : i32
    return %c0_i32, %c0_i32_0, %c0_i32_1 : i32, i32, i32
  }
  func.func @transform_1(%arg0: i32) -> (i32, i32) {
    %c0_i32 = arith.constant 0 : i32
    %c0_i32_0 = arith.constant 0 : i32
    %c0_i32_1 = arith.constant 0 : i32
    return %c0_i32, %c0_i32_0 : i32, i32
  }
  func.func @transform_2(%arg0: i32) -> i32 {
    %c0_i32 = arith.constant 0 : i32
    %c0_i32_0 = arith.constant 0 : i32
    return %c0_i32 : i32
  }
  func.func @transform_3(%arg0: i32) -> i32 {
    %c0_i32 = arith.constant 0 : i32
    %c0_i32_0 = arith.constant 0 : i32
    return %c0_i32 : i32
  }
  func.func @transform_4(%arg0: i32) -> i32 {
    %c0_i32 = arith.constant 0 : i32
    %c0_i32_0 = arith.constant 0 : i32
    return %c0_i32 : i32
  }
  func.func @transform_5(%arg0: i32) -> (i32, i32) {
    %c0_i32 = arith.constant 0 : i32
    %c0_i32_0 = arith.constant 0 : i32
    return %arg0, %c0_i32 : i32, i32
  }
  func.func @transform_6(%arg0: i32) -> (i32, i32) {
    %c0_i32 = arith.constant 0 : i32
    %c0_i32_0 = arith.constant 0 : i32
    return %c0_i32, %arg0 : i32, i32
  }
  func.func @transform_7(%arg0: i32) -> (i32, i32) {
    %c0_i32 = arith.constant 0 : i32
    %c0_i32_0 = arith.constant 0 : i32
    return %c0_i32, %arg0 : i32, i32
  }
}

</mosaic_0001>

<bundles_post_ra>
// kernel: tpu_custom_call.1
= control target key start
LH: loop header
LB: loop body
LE: loop exit
PB: predicated region body
PF: predicated region fallthrough
CT: control target
= control target key end

     0   :  { %12 = vsyncpa [#allocation4], 0  ;;  %s1130_s0 = inlined_call_operand.hbm [shape: f32[2,4,256], index: 0, kind: input, shape index: {}]   ;;  %s1131_s1 = inlined_call_operand.hbm [shape: f32[2,4], index: 1, kind: input, shape index: {}]   ;;  %s1132_s2 = inlined_call_operand.vmem [shape: f32[2], index: 2, kind: input, shape index: {}]   ;;  %s1133_s3 = inlined_call_operand.vmem [shape: f32[2], index: 3, kind: input, shape index: {}]   ;;  %s1134_s4 = inlined_call_operand.vmem [shape: f32[2], index: 4, kind: input, shape index: {}]   ;;  %s1135_s5 = inlined_call_operand.hbm [shape: f32[256,512], index: 5, kind: input, shape index: {}]   ;;  %s1136_s6 = inlined_call_operand.vmem [shape: f32[1,256], index: 6, kind: input, shape index: {}]   ;;  %s1137_s7 = inlined_call_operand.hbm [shape: f32[2,256], index: 7, kind: output, shape index: {}]  }
   0x1   :  { %13 = vsyncpa [#allocation6], 0 }
   0x2   :  { %14 = vsyncpa [#allocation7], 0 }
   0x3   :  { %15 = vsyncpa [#allocation11], 0 }
   0x4   :  { %16 = vsyncpa [#allocation14], 0  ;;  %s54_s26 = sshll.u32 %s1133_s3, 4  ;;  %s55_s26 = int_to_ptr.vmem [resolvable:$true] %s54_s26 }
   0x5   :  { %17 = vsyncpa [#allocation5], 0  ;;  %s834_s27 = scalar_lea.vmem %s55_s26, 16  ;;  %p839_p1 = scmp.lt.s32.totalorder %s55_s26, %s55_s26 }
   0x6   :  { %p835_p0 = scmp.ne.s32.totalorder %s55_s26, %s834_s27  ;;  %p840_p2 = scmp.lt.s32.totalorder %s834_s27, %s834_s27 }
   0x8   :  { %p841_p3 = por %p840_p2, %p839_p1 }
   0xa   :  { %p842_p4 = pnand %p841_p3, %p835_p0 }
   0xc   :  { %845 = shalt.err (!%p842_p4)
}
   0xd   :  { %s950_s28 = smov [#allocation10]   ;;  %s951_s29 = smov [#allocation3]  }
   0xe   :  { %57 = dma.vmem_to_smem %s55_s26, 16, %s950_s28, [#allocation11]  }
   0xf   :  { %s23_s30 = sshll.u32 %s951_s29, 4  ;;  %s24_s30 = int_to_ptr.vmem [resolvable:$true] %s23_s30 }
  0x10   :  { %s854_s8 = scalar_lea.vmem %s24_s30, 256  ;;  %p859_p6 = scmp.lt.s32.totalorder %s24_s30, %s24_s30 }
  0x11   :  { %p855_p5 = scmp.ne.s32.totalorder %s24_s30, %s854_s8  ;;  %p860_p7 = scmp.lt.s32.totalorder %s854_s8, %s854_s8 }
  0x13   :  { %p861_p8 = por %p860_p7, %p859_p6 }
  0x15   :  { %p862_p9 = pnand %p861_p8, %p855_p5 }
  0x17   :  { %865 = shalt.err (!%p862_p9)
}
  0x18   :  { %s952_s3 = smov 128   ;;  %s953_s9 = smov 8  }
  0x19   :  { %29 = dma.hbm_to_vmem [thread:$0]  %s1130_s0, 256, %s24_s30, [#allocation4], %s952_s3, %s952_s3, %s953_s9  }
  0x1a   :  { %s44_s14 = sshll.u32 %s1132_s2, 4  ;;  %s954_s15 = smov [#allocation8]   ;;  %s45_s14 = int_to_ptr.vmem [resolvable:$true] %s44_s14 }
  0x1b   :  { %37 = dma.hbm_to_smem %s1131_s1, 32, %s954_s15, [#allocation6]  }
  0x1c   :  { %s874_s18 = scalar_lea.vmem %s45_s14, 16  ;;  %p879_p11 = scmp.lt.s32.totalorder %s45_s14, %s45_s14 }
  0x1d   :  { %p875_p10 = scmp.ne.s32.totalorder %s45_s14, %s874_s18  ;;  %p880_p12 = scmp.lt.s32.totalorder %s874_s18, %s874_s18 }
  0x1f   :  { %p881_p13 = por %p880_p12, %p879_p11 }
  0x21   :  { %p882_p0 = pnand %p881_p13, %p875_p10 }
  0x23   :  { %885 = shalt.err (!%p882_p0)
}
  0x24   :  { %s955_s19 = smov [#allocation9]   ;;  %s64_s21 = sshll.u32 %s1134_s4, 4  ;;  %s65_s21 = int_to_ptr.vmem [resolvable:$true] %s64_s21 }
  0x25   :  { %47 = dma.vmem_to_smem %s45_s14, 16, %s955_s19, [#allocation7]  }
  0x26   :  { %s886_s2 = scalar_lea.vmem %s65_s21, 16  ;;  %p891_p2 = scmp.lt.s32.totalorder %s65_s21, %s65_s21 }
  0x27   :  { %p887_p1 = scmp.ne.s32.totalorder %s65_s21, %s886_s2  ;;  %p892_p3 = scmp.lt.s32.totalorder %s886_s2, %s886_s2 }
  0x29   :  { %p893_p4 = por %p892_p3, %p891_p2 }
  0x2b   :  { %p894_p5 = pnand %p893_p4, %p887_p1 }
  0x2d   :  { %897 = shalt.err (!%p894_p5)
}
  0x2e   :  { %s956_s1 = smov [#allocation12]   ;;  %s957_s22 = smov [#allocation13]  }
  0x2f   :  { %67 = dma.vmem_to_smem %s65_s21, 16, %s956_s1, [#allocation11]  }
  0x30   :  { %s73_s23 = sshll.u32 %s957_s22, 4  ;;  %s74_s23 = int_to_ptr.vmem [resolvable:$true] %s73_s23 }
  0x31   :  { %s906_s24 = scalar_lea.vmem %s74_s23, 16384  ;;  %p911_p7 = scmp.lt.s32.totalorder %s74_s23, %s74_s23 }
  0x32   :  { %p907_p6 = scmp.ne.s32.totalorder %s74_s23, %s906_s24  ;;  %p912_p8 = scmp.lt.s32.totalorder %s906_s24, %s906_s24 }
  0x34   :  { %p913_p9 = por %p912_p8, %p911_p7 }
  0x36   :  { %p914_p10 = pnand %p913_p9, %p907_p6 }
  0x38   :  { %917 = shalt.err (!%p914_p10)
}
  0x39   :  { %s958_s4 = smov 512   ;;  %s959_s25 = smov 32  }
  0x3a   :  { %79 = dma.hbm_to_vmem [thread:$0]  %s1135_s5, 16384, %s74_s23, [#allocation14], %s958_s4, %s958_s4, %s959_s25  }
  0x3b   :  { %938 = dma.done.wait [#allocation4], 256  }
  0x3c   :  { %939 = vsyncadd [#allocation4], 4294967040 }
  0x3d   :  { %940 = dma.done.wait [#allocation6], 32  }
  0x3e   :  { %941 = vsyncadd [#allocation6], 4294967264 }
  0x3f   :  { %942 = dma.done.wait [#allocation7], 16  }
  0x40   :  { %943 = vsyncadd [#allocation7], 4294967280 }
  0x41   :  { %944 = dma.done.wait [#allocation11], 32  }
  0x42   :  { %945 = vsyncadd [#allocation11], 4294967264 }
  0x43   :  { %946 = dma.done.wait [#allocation14], 16384  }
  0x44   :  { %947 = vsyncadd [#allocation14], 4294950912 }
  0x45   :  { %100 = sfence }
  0x46   :  { %s107_s28 = sld [smem:[#allocation8]]  ;;  %v159_v0 = vlaneseq  ;;  %v105_v1 = vld [vmem:[#allocation3] sm:$0xff]  ;;  %v106_v2 = vld [vmem:[#allocation3 + $0x8] sm:$0xff]  ;;  %vm175_vm0 = vcmask 1041409   ;;  %vm180_vm1 = vcmask 1041408   ;;  %vm272_vm2 = vcmask 1043459  }
  0x47   :  { %s782_s29 = sld [smem:[#allocation8 + $0x1]]  ;;  %vm274_vm3 = vcmask 1045509   ;;  %vm276_vm4 = vcmask 1047559  }
  0x48   :  { %s785_s30 = sld [smem:[#allocation8 + $0x2]]  ;;  %v1022_v3 = vshrl.u32 %v159_v0, 7 }
  0x49   :  { %s788_s8 = sld [smem:[#allocation8 + $0x3]] }
  0x4a   :  { %s1020_s3 = sld [smem:[#allocation9]]  ;;  %v1031_v14 = vsub.s32 0, %v1022_v3  ;;  %v1034_v21 = vsub.s32 4, %v1022_v3 }
  0x4b   :  { %s791_s5 = sld [smem:[#allocation8 + $0x80]] }
  0x4c   :  { %v108_v4 = vstv %s107_s28  ;;  %s1024_s9 = sld [smem:[#allocation8 + $0x81]] }
  0x4d   :  { %v109_v5 = vmul.f32 %v108_v4, %v105_v1  ;;  %v112_v6 = vstv %s782_s29  ;;  %s1026_s10 = sld [smem:[#allocation8 + $0x82]]  ;;  %v110_v7 = vmul.f32 %v108_v4, %v106_v2 }
  0x4e   :  { %v113_v8 = vmul.f32 %v112_v6, %v105_v1  ;;  %v114_v9 = vmul.f32 %v112_v6, %v106_v2  ;;  %v126_v10 = vstv %s785_s30  ;;  %s1028_s11 = sld [smem:[#allocation8 + $0x83]] }
  0x4f   :  { %v127_v11 = vmul.f32 %v126_v10, %v105_v1  ;;  %v128_v12 = vmul.f32 %v126_v10, %v106_v2  ;;  %v140_v13 = vstv %s788_s8  ;;  %s1038_s12 = sld [smem:[#allocation9 + $0x1]] }
  0x50   :  { %v783_v15 = vrot.slane %v113_v8, 9  ;;  %v784_v16 = vrot.slane %v114_v9, 9  ;;  %v141_v17 = vmul.f32 %v140_v13, %v105_v1  ;;  %v142_v18 = vmul.f32 %v140_v13, %v106_v2  ;;  %s233_s0 = sld [smem:[#allocation10]] }
  0x51   :  { %v786_v19 = vrot.slane %v127_v11, 10  ;;  %v787_v20 = vrot.slane %v128_v12, 10  ;;  %v281_v22 = vstv %s791_s5  ;;  %v154_v35 = vstv %s1020_s3  ;;  %s239_s20 = sld [smem:[#allocation12]] }
  0x52   :  { %v123_v23 = vadd.f32 %v783_v15, %v109_v5  ;;  %v124_v24 = vadd.f32 %v784_v16, %v110_v7  ;;  %v789_v25 = vrot.slane %v141_v17, 11  ;;  %v790_v26 = vrot.slane %v142_v18, 11  ;;  %s802_s29 = sld [smem:[#allocation10 + $0x1]] }
  0x53   :  { %v282_v27 = vmul.f32 %v281_v22, %v105_v1  ;;  %v283_v28 = vmul.f32 %v281_v22, %v106_v2  ;;  %v285_v29 = vstv %s1024_s9  ;;  %v299_v30 = vstv %s1026_s10  ;;  %s803_s30 = sld [smem:[#allocation12 + $0x1]] }
  0x54   :  { %v137_v31 = vadd.f32 %v786_v19, %v123_v23  ;;  %v138_v32 = vadd.f32 %v787_v20, %v124_v24  ;;  %v286_v33 = vmul.f32 %v285_v29, %v105_v1  ;;  %v287_v34 = vmul.f32 %v285_v29, %v106_v2 }
  0x55   :  { %v300_v36 = vmul.f32 %v299_v30, %v105_v1  ;;  %v301_v37 = vmul.f32 %v299_v30, %v106_v2  ;;  %v313_v38 = vstv %s1028_s11  ;;  %v327_v63 = vstv %s1038_s12  ;;  %s961_s12 = smov [#allocation15]  }
  0x56   :  { %v151_v39 = vadd.f32 %v789_v25, %v137_v31  ;;  %v152_v40 = vadd.f32 %v790_v26, %v138_v32  ;;  %v793_v41 = vrot.slane %v286_v33, 9  ;;  %v794_v42 = vrot.slane %v287_v34, 9 }
  0x57   :  { %v796_v43 = vrot.slane %v300_v36, 10  ;;  %v797_v44 = vrot.slane %v301_v37, 10  ;;  %v314_v45 = vmul.f32 %v313_v38, %v105_v1  ;;  %v315_v46 = vmul.f32 %v313_v38, %v106_v2 }
  0x58   :  { %v1042_v47 = vadd.f32 %v154_v35, %v151_v39  ;;  %v1044_v48 = vadd.f32 %v154_v35, %v152_v40  ;;  %v296_v49 = vadd.f32 %v793_v41, %v282_v27  ;;  %v297_v50 = vadd.f32 %v794_v42, %v283_v28  ;;  %v508_v39 = vld [vmem:[#allocation13 + $0x1e8] sm:$0xff]  ;;  %v507_v40 = vld [vmem:[#allocation13 + $0x1e0] sm:$0xff]  ;;  %v510_v41 = vld [vmem:[#allocation13 + $0x1f8] sm:$0xff] }
  0x59   :  { %v799_v51 = vrot.slane %v314_v45, 11  ;;  %v800_v52 = vrot.slane %v315_v46, 11  ;;  %609 = vmatprep.subr.mxu0 %v508_v39  ;;  %680 = vmatprep.subr.mxu1 %v510_v41  ;;  %v504_v42 = vld [vmem:[#allocation13 + $0x1c8] sm:$0xff]  ;;  %v505_v45 = vld [vmem:[#allocation13 + $0x1d0] sm:$0xff]  ;;  %v466_v41 = vld [vmem:[#allocation13 + $0x98] sm:$0xff] }
  0x5a   :  { %v162_v53 = vrot.slane %v1042_v47, %v1031_v14  ;;  %v166_v54 = vrot.slane %v1042_v47, %v1034_v21  ;;  %v170_v55 = vrot.slane %v1044_v48, %v1031_v14  ;;  %v174_v56 = vrot.slane %v1044_v48, %v1034_v21  ;;  %610 = vmatpush1.xpose.msra.mxu0 %v507_v40  ;;  %v500_v46 = vld [vmem:[#allocation13 + $0x1a8] sm:$0xff]  ;;  %v469_v39 = vld [vmem:[#allocation13 + $0xb0] sm:$0xff]  ;;  %v463_v40 = vld [vmem:[#allocation13 + $0x80] sm:$0xff] }
  0x5b   :  { %v193_v57 = vmul.f32 %v1042_v47, %v1042_v47  ;;  %v194_v58 = vmul.f32 %v1044_v48, %v1044_v48  ;;  %v310_v59 = vadd.f32 %v796_v43, %v296_v49  ;;  %v311_v60 = vadd.f32 %v797_v44, %v297_v50  ;;  %v506_v43 = vld [vmem:[#allocation13 + $0x1d8] sm:$0xff]  ;;  %611 = vmatprep.subr.mxu0 %v504_v42  ;;  %v503_v44 = vld [vmem:[#allocation13 + $0x1c0] sm:$0xff]  ;;  %v460_v42 = vld [vmem:[#allocation13 + $0x68] sm:$0xff] }
  0x5c   :  { %v176_v61 = vsel %vm175_vm0, %v170_v55, %v162_v53  ;;  %v177_v62 = vsel %vm175_vm0, %v174_v56, %v166_v54  ;;  %v502_v49 = vld [vmem:[#allocation13 + $0x1b8] sm:$0xff]  ;;  %v499_v50 = vld [vmem:[#allocation13 + $0x1a0] sm:$0xff]  ;;  %v497_v55 = vld [vmem:[#allocation13 + $0x190] sm:$0xff] }
  0x5d   :  { %v181_v0 = vsel %vm180_vm1, %v176_v61, 0.0  ;;  %v182_v1 = vsel %vm180_vm1, %v177_v62, 0.0  ;;  %v200_v2 = vrot.slane %v193_v57, %v1031_v14  ;;  %v204_v4 = vrot.slane %v193_v57, %v1034_v21  ;;  %v498_v53 = vld [vmem:[#allocation13 + $0x198] sm:$0xff]  ;;  %v495_v54 = vld [vmem:[#allocation13 + $0x180] sm:$0xff]  ;;  %v492_v56 = vld [vmem:[#allocation13 + $0x168] sm:$0xff] }
  0x5e   :  { %v183_v5 = vadd.f32 %v182_v1, %v181_v0  ;;  %v208_v6 = vrot.slane %v194_v58, %v1031_v14  ;;  %v212_v7 = vrot.slane %v194_v58, %v1034_v21  ;;  %v324_v8 = vadd.f32 %v799_v51, %v310_v59  ;;  %612 = vmatpush1.xpose.msra.mxu0 %v503_v44  ;;  %v501_v51 = vld [vmem:[#allocation13 + $0x1b0] sm:$0xff]  ;;  %v494_v57 = vld [vmem:[#allocation13 + $0x178] sm:$0xff]  ;;  %v491_v58 = vld [vmem:[#allocation13 + $0x160] sm:$0xff] }
  0x5f   :  { %v325_v9 = vadd.f32 %v800_v52, %v311_v60  ;;  %613 = vmatprep.subr.mxu0 %v500_v46  ;;  %v496_v52 = vld [vmem:[#allocation13 + $0x188] sm:$0xff]  ;;  %v493_v59 = vld [vmem:[#allocation13 + $0x170] sm:$0xff]  ;;  %v487_v61 = vld [vmem:[#allocation13 + $0x140] sm:$0xff] }
  0x60   :  { %184 = vadd.xlane.f32.xlu0 %v183_v5  ;;  %v213_v10 = vsel %vm175_vm0, %v208_v6, %v200_v2  ;;  %v214_v11 = vsel %vm175_vm0, %v212_v7, %v204_v4  ;;  %v1069_v12 = vadd.f32 %v327_v63, %v324_v8  ;;  %v488_v60 = vld [vmem:[#allocation13 + $0x148] sm:$0xff]  ;;  %v459_v44 = vld [vmem:[#allocation13 + $0x60] sm:$0xff]  ;;  %v461_v46 = vld [vmem:[#allocation13 + $0x70] sm:$0xff] }
  0x61   :  { %v217_v13 = vsel %vm180_vm1, %v213_v10, 0.0  ;;  %v218_v15 = vsel %vm180_vm1, %v214_v11, 0.0  ;;  %v1073_v16 = vadd.f32 %v327_v63, %v325_v9  ;;  %v490_v11 = vld [vmem:[#allocation13 + $0x158] sm:$0xff] }
  0x62   :  { %v219_v17 = vadd.f32 %v218_v15, %v217_v13  ;;  %v335_v18 = vrot.slane %v1069_v12, %v1031_v14  ;;  %v339_v19 = vrot.slane %v1069_v12, %v1034_v21  ;;  %v364_v20 = vmul.f32 %v1069_v12, %v1069_v12  ;;  %614 = vmatpush1.xpose.msra.mxu0 %v499_v50  ;;  %v489_v15 = vld [vmem:[#allocation13 + $0x150] sm:$0xff]  ;;  %v455_v50 = vld [vmem:[#allocation13 + $0x40] sm:$0xff] }
  0x63   :  { %v343_v22 = vrot.slane %v1073_v16, %v1031_v14  ;;  %v347_v23 = vrot.slane %v1073_v16, %v1034_v21  ;;  %v365_v24 = vmul.f32 %v1073_v16, %v1073_v16  ;;  %615 = vmatprep.subr.mxu0 %v496_v52  ;;  %v457_v52 = vld [vmem:[#allocation13 + $0x50] sm:$0xff] }
  0x64   :  { %220 = vadd.xlane.f32.xlu0 %v219_v17  ;;  %v371_v25 = vrot.slane %v364_v20, %v1031_v14  ;;  %v375_v26 = vrot.slane %v364_v20, %v1034_v21  ;;  %v484_v17 = vld [vmem:[#allocation13 + $0x128] sm:$0xff]  ;;  %v486_v20 = vld [vmem:[#allocation13 + $0x138] sm:$0xff] }
  0x65   :  { %v348_v27 = vsel %vm175_vm0, %v343_v22, %v335_v18  ;;  %v349_v28 = vsel %vm175_vm0, %v347_v23, %v339_v19  ;;  %v379_v29 = vrot.slane %v365_v24, %v1031_v14  ;;  %v383_v30 = vrot.slane %v365_v24, %v1034_v21  ;;  %v509_v21 = vld [vmem:[#allocation13 + $0x1f0] sm:$0xff]  ;;  %v483_v19 = vld [vmem:[#allocation13 + $0x120] sm:$0xff]  ;;  %v480_v23 = vld [vmem:[#allocation13 + $0x108] sm:$0xff] }
  0x66   :  { %v352_v31 = vsel %vm180_vm1, %v348_v27, 0.0  ;;  %v353_v32 = vsel %vm180_vm1, %v349_v28, 0.0  ;;  %681 = vmatpush1.xpose.msra.mxu1 %v509_v21  ;;  %616 = vmatpush1.xpose.msra.mxu0 %v495_v54  ;;  %v485_v22 = vld [vmem:[#allocation13 + $0x130] sm:$0xff]  ;;  %v479_v24 = vld [vmem:[#allocation13 + $0x100] sm:$0xff]  ;;  %v476_v27 = vld [vmem:[#allocation13 + $0xe8] sm:$0xff] }
  0x67   :  { %v354_v33 = vadd.f32 %v353_v32, %v352_v31  ;;  %v384_v34 = vsel %vm175_vm0, %v379_v29, %v371_v25  ;;  %v385_v35 = vsel %vm175_vm0, %v383_v30, %v375_v26  ;;  %682 = vmatprep.subr.mxu1 %v506_v43  ;;  %617 = vmatprep.subr.mxu0 %v492_v56  ;;  %v482_v25 = vld [vmem:[#allocation13 + $0x118] sm:$0xff]  ;;  %v481_v26 = vld [vmem:[#allocation13 + $0x110] sm:$0xff]  ;;  %v475_v28 = vld [vmem:[#allocation13 + $0xe0] sm:$0xff] }
  0x68   :  { %v388_v36 = vsel %vm180_vm1, %v384_v34, 0.0  ;;  %v389_v37 = vsel %vm180_vm1, %v385_v35, 0.0  ;;  %v478_v29 = vld [vmem:[#allocation13 + $0xf8] sm:$0xff]  ;;  %v477_v30 = vld [vmem:[#allocation13 + $0xf0] sm:$0xff]  ;;  %v472_v31 = vld [vmem:[#allocation13 + $0xc8] sm:$0xff] }
  0x69   :  { %355 = vadd.xlane.f32.xlu1 %v354_v33  ;;  %v390_v38 = vadd.f32 %v389_v37, %v388_v36  ;;  %v471_v32 = vld [vmem:[#allocation13 + $0xc0] sm:$0xff]  ;;  %v474_v33 = vld [vmem:[#allocation13 + $0xd8] sm:$0xff]  ;;  %v473_v34 = vld [vmem:[#allocation13 + $0xd0] sm:$0xff] }
  0x6a   :  { %683 = vmatpush1.xpose.msra.mxu1 %v505_v45  ;;  %618 = vmatpush1.xpose.msra.mxu0 %v491_v58  ;;  %v468_v35 = vld [vmem:[#allocation13 + $0xa8] sm:$0xff]  ;;  %v467_v36 = vld [vmem:[#allocation13 + $0xa0] sm:$0xff]  ;;  %v470_v37 = vld [vmem:[#allocation13 + $0xb8] sm:$0xff] }
  0x6b   :  { %684 = vmatprep.subr.mxu1 %v502_v49  ;;  %619 = vmatprep.subr.mxu0 %v488_v60  ;;  %v465_v21 = vld [vmem:[#allocation13 + $0x90] sm:$0xff]  ;;  %v462_v43 = vld [vmem:[#allocation13 + $0x78] sm:$0xff]  ;;  %v456_v45 = vld [vmem:[#allocation13 + $0x48] sm:$0xff] }
  0x6c   :  { %v458_v49 = vld [vmem:[#allocation13 + $0x58] sm:$0xff]  ;;  %v451_v54 = vld [vmem:[#allocation13 + $0x20] sm:$0xff]  ;;  %v453_v56 = vld [vmem:[#allocation13 + $0x30] sm:$0xff] }
  0x6d   :  { %391 = vadd.xlane.f32.xlu1 %v390_v38  ;;  %v464_v38 = vld [vmem:[#allocation13 + $0x88] sm:$0xff]  ;;  %v447_v58 = vld [vmem:[#allocation13] sm:$0xff]  ;;  %v449_v60 = vld [vmem:[#allocation13 + $0x10] sm:$0xff] }
  0x6e   :  { %685 = vmatpush1.xpose.msra.mxu1 %v501_v51  ;;  %620 = vmatpush1.xpose.msra.mxu0 %v487_v61  ;;  %v452_v51 = vld [vmem:[#allocation13 + $0x28] sm:$0xff]  ;;  %v574_v61 = vld [vmem:[#allocation13 + $0x3f8] sm:$0xff] }
  0x6f   :  { %686 = vmatprep.subr.mxu1 %v498_v53  ;;  %621 = vmatprep.subr.mxu0 %v484_v17  ;;  %v454_v53 = vld [vmem:[#allocation13 + $0x38] sm:$0xff]  ;;  %v556_v17 = vld [vmem:[#allocation13 + $0x368] sm:$0xff] }
  0x72   :  { %687 = vmatpush1.xpose.msra.mxu1 %v497_v55  ;;  %622 = vmatpush1.xpose.msra.mxu0 %v483_v19  ;;  %v448_v55 = vld [vmem:[#allocation13 + $0x8] sm:$0xff]  ;;  %v561_v19 = vld [vmem:[#allocation13 + $0x390] sm:$0xff] }
  0x73   :  { %688 = vmatprep.subr.mxu1 %v494_v57  ;;  %623 = vmatprep.subr.mxu0 %v480_v23  ;;  %v450_v57 = vld [vmem:[#allocation13 + $0x18] sm:$0xff]  ;;  %v555_v23 = vld [vmem:[#allocation13 + $0x360] sm:$0xff] }
  0x76   :  { %689 = vmatpush1.xpose.msra.mxu1 %v493_v59  ;;  %624 = vmatpush1.xpose.msra.mxu0 %v479_v24  ;;  %v572_v59 = vld [vmem:[#allocation13 + $0x3e8] sm:$0xff] }
  0x77   :  { %690 = vmatprep.subr.mxu1 %v490_v11  ;;  %625 = vmatprep.subr.mxu0 %v476_v27  ;;  %v562_v11 = vld [vmem:[#allocation13 + $0x398] sm:$0xff]  ;;  %v552_v24 = vld [vmem:[#allocation13 + $0x348] sm:$0xff] }
  0x7a   :  { %691 = vmatpush1.xpose.msra.mxu1 %v489_v15  ;;  %626 = vmatpush1.xpose.msra.mxu0 %v475_v28  ;;  %v559_v15 = vld [vmem:[#allocation13 + $0x380] sm:$0xff]  ;;  %v554_v28 = vld [vmem:[#allocation13 + $0x358] sm:$0xff] }
  0x7b   :  { %692 = vmatprep.subr.mxu1 %v486_v20  ;;  %627 = vmatprep.subr.mxu0 %v472_v31  ;;  %v548_v31 = vld [vmem:[#allocation13 + $0x328] sm:$0xff] }
  0x7e   :  { %693 = vmatpush1.xpose.msra.mxu1 %v485_v22  ;;  %628 = vmatpush1.xpose.msra.mxu0 %v471_v32  ;;  %v558_v22 = vld [vmem:[#allocation13 + $0x378] sm:$0xff] }
  0x7f   :  { %694 = vmatprep.subr.mxu1 %v482_v25  ;;  %629 = vmatprep.subr.mxu0 %v468_v35  ;;  %v550_v35 = vld [vmem:[#allocation13 + $0x338] sm:$0xff] }
  0x82   :  { %695 = vmatpush1.xpose.msra.mxu1 %v481_v26  ;;  %630 = vmatpush1.xpose.msra.mxu0 %v467_v36  ;;  %v557_v26 = vld [vmem:[#allocation13 + $0x370] sm:$0xff]  ;;  %v547_v36 = vld [vmem:[#allocation13 + $0x320] sm:$0xff] }
  0x83   :  { %696 = vmatprep.subr.mxu1 %v478_v29  ;;  %631 = vmatprep.subr.mxu0 %v464_v38 }
  0x86   :  { %697 = vmatpush1.xpose.msra.mxu1 %v477_v30  ;;  %632 = vmatpush1.xpose.msra.mxu0 %v463_v40  ;;  %v551_v30 = vld [vmem:[#allocation13 + $0x340] sm:$0xff] }
  0x87   :  { %698 = vmatprep.subr.mxu1 %v474_v33  ;;  %633 = vmatprep.subr.mxu0 %v460_v42  ;;  %v553_v33 = vld [vmem:[#allocation13 + $0x350] sm:$0xff] }
  0x8a   :  { %699 = vmatpush1.xpose.msra.mxu1 %v473_v34  ;;  %634 = vmatpush1.xpose.msra.mxu0 %v459_v44  ;;  %v545_v44 = vld [vmem:[#allocation13 + $0x310] sm:$0xff] }
  0x8b   :  { %700 = vmatprep.subr.mxu1 %v470_v37  ;;  %635 = vmatprep.subr.mxu0 %v456_v45  ;;  %v544_v37 = vld [vmem:[#allocation13 + $0x308] sm:$0xff] }
  0x8c   :  { %v540_v45 = vld [vmem:[#allocation13 + $0x2e8] sm:$0xff] }
  0x8e   :  { %701 = vmatpush1.xpose.msra.mxu1 %v469_v39  ;;  %636 = vmatpush1.xpose.msra.mxu0 %v455_v50  ;;  %v549_v39 = vld [vmem:[#allocation13 + $0x330] sm:$0xff]  ;;  %v539_v50 = vld [vmem:[#allocation13 + $0x2e0] sm:$0xff] }
  0x8f   :  { %702 = vmatprep.subr.mxu1 %v466_v41  ;;  %637 = vmatprep.subr.mxu0 %v452_v51  ;;  %v546_v41 = vld [vmem:[#allocation13 + $0x318] sm:$0xff] }
  0x92   :  { %703 = vmatpush1.xpose.msra.mxu1 %v465_v21  ;;  %638 = vmatpush1.xpose.msra.mxu0 %v451_v54  ;;  %v543_v21 = vld [vmem:[#allocation13 + $0x300] sm:$0xff]  ;;  %v536_v54 = vld [vmem:[#allocation13 + $0x2c8] sm:$0xff] }
  0x93   :  { %704 = vmatprep.subr.mxu1 %v462_v43  ;;  %639 = vmatprep.subr.mxu0 %v448_v55  ;;  %v535_v55 = vld [vmem:[#allocation13 + $0x2c0] sm:$0xff] }
  0x96   :  { %705 = vmatpush1.xpose.msra.mxu1 %v461_v46  ;;  %640 = vmatpush1.xpose.msra.mxu0 %v447_v58  ;;  %v532_v58 = vld [vmem:[#allocation13 + $0x2a8] sm:$0xff] }
  0x97   :  { %706 = vmatprep.subr.mxu1 %v458_v49  ;;  %641 = vmatprep.subr.mxu0 %v572_v59  ;;  %v531_v59 = vld [vmem:[#allocation13 + $0x2a0] sm:$0xff] }
  0x9a   :  { %707 = vmatpush1.xpose.msra.mxu1 %v457_v52  ;;  %v542_v52 = vld [vmem:[#allocation13 + $0x2f8] sm:$0xff] }
  0x9b   :  { %708 = vmatprep.subr.mxu1 %v454_v53  ;;  %v541_v53 = vld [vmem:[#allocation13 + $0x2f0] sm:$0xff] }
  0x9e   :  { %709 = vmatpush1.xpose.msra.mxu1 %v453_v56  ;;  %v538_v56 = vld [vmem:[#allocation13 + $0x2d8] sm:$0xff] }
  0x9f   :  { %710 = vmatprep.subr.mxu1 %v450_v57  ;;  %v537_v57 = vld [vmem:[#allocation13 + $0x2d0] sm:$0xff] }
  0xa2   :  { %711 = vmatpush1.xpose.msra.mxu1 %v449_v60  ;;  %v534_v60 = vld [vmem:[#allocation13 + $0x2b8] sm:$0xff] }
  0xa3   :  { %712 = vmatprep.subr.mxu1 %v574_v61  ;;  %v533_v61 = vld [vmem:[#allocation13 + $0x2b0] sm:$0xff] }
  0xe9   :  { %v185_v62 = vpop.xlane.xlu0 %184 }
  0xea   :  { %v186_v63 = vrot.slane %v185_v62, 4 }
  0xec   :  { %v187_v0 = vadd.f32 %v186_v63, %v185_v62  ;;  %v571_v62 = vld [vmem:[#allocation13 + $0x3e0] sm:$0xff]  ;;  %v568_v63 = vld [vmem:[#allocation13 + $0x3c8] sm:$0xff] }
  0xed   :  { %v221_v1 = vpop.xlane.xlu0 %220  ;;  %642 = vmatpush2.xpose.msra.mxu0 %v571_v62  ;;  %v528_v62 = vld [vmem:[#allocation13 + $0x288] sm:$0xff] }
  0xee   :  { %v188_v2 = vrot.slane %v187_v0, 2  ;;  %v222_v4 = vrot.slane %v221_v1, 4  ;;  %643 = vmatprep.subr.mxu0 %v568_v63  ;;  %v527_v63 = vld [vmem:[#allocation13 + $0x280] sm:$0xff] }
  0xf0   :  { %v223_v5 = vadd.f32 %v222_v4, %v221_v1  ;;  %v189_v6 = vadd.f32 %v188_v2, %v187_v0  ;;  %v573_v0 = vld [vmem:[#allocation13 + $0x3f0] sm:$0xff]  ;;  %v570_v1 = vld [vmem:[#allocation13 + $0x3d8] sm:$0xff]  ;;  %v567_v2 = vld [vmem:[#allocation13 + $0x3c0] sm:$0xff] }
  0xf1   :  { %713 = vmatpush2.xpose.msra.mxu1 %v573_v0  ;;  %v564_v4 = vld [vmem:[#allocation13 + $0x3a8] sm:$0xff]  ;;  %644 = vmatpush2.xpose.msra.mxu0 %v567_v2  ;;  %v530_v0 = vld [vmem:[#allocation13 + $0x298] sm:$0xff] }
  0xf2   :  { %v224_v7 = vrot.slane %v223_v5, 2  ;;  %v190_v8 = vrot.slane %v189_v6, 1  ;;  %714 = vmatprep.subr.mxu1 %v570_v1  ;;  %645 = vmatprep.subr.mxu0 %v564_v4  ;;  %v529_v1 = vld [vmem:[#allocation13 + $0x290] sm:$0xff]  ;;  %v524_v2 = vld [vmem:[#allocation13 + $0x268] sm:$0xff]  ;;  %v523_v4 = vld [vmem:[#allocation13 + $0x260] sm:$0xff] }
  0xf4   :  { %v225_v9 = vadd.f32 %v224_v7, %v223_v5  ;;  %v191_v10 = vadd.f32 %v190_v8, %v189_v6  ;;  %v356_v5 = vpop.xlane.xlu1 %355  ;;  %v569_v6 = vld [vmem:[#allocation13 + $0x3d0] sm:$0xff]  ;;  %v566_v7 = vld [vmem:[#allocation13 + $0x3b8] sm:$0xff]  ;;  %v563_v8 = vld [vmem:[#allocation13 + $0x3a0] sm:$0xff] }
  0xf5   :  { %715 = vmatpush2.xpose.msra.mxu1 %v569_v6  ;;  %646 = vmatpush2.xpose.msra.mxu0 %v563_v8  ;;  %v525_v6 = vld [vmem:[#allocation13 + $0x270] sm:$0xff]  ;;  %v519_v8 = vld [vmem:[#allocation13 + $0x240] sm:$0xff] }
  0xf6   :  { %805 = vpush %v191_v10  ;;  %v226_v13 = vrot.slane %v225_v9, 1  ;;  %716 = vmatprep.subr.mxu1 %v566_v7  ;;  %v565_v10 = vld [vmem:[#allocation13 + $0x3b0] sm:$0xff]  ;;  %v520_v7 = vld [vmem:[#allocation13 + $0x248] sm:$0xff] }
  0xf8   :  { %v227_v18 = vadd.f32 %v226_v13, %v225_v9  ;;  %v560_v9 = vld [vmem:[#allocation13 + $0x388] sm:$0xff]  ;;  %v392_v13 = vpop.xlane.xlu1 %391 }
  0xf9   :  { %647 = vmatprep.subr.mxu0 %v560_v9  ;;  %717 = vmatpush2.xpose.msra.mxu1 %v565_v10  ;;  %v393_v20 = vrot.slane %v392_v13, 4  ;;  %v522_v9 = vld [vmem:[#allocation13 + $0x258] sm:$0xff]  ;;  %v516_v10 = vld [vmem:[#allocation13 + $0x228] sm:$0xff] }
  0xfa   :  { %807 = vpush %v227_v18  ;;  %v357_v18 = vrot.slane %v356_v5, 4  ;;  %718 = vmatprep.subr.mxu1 %v562_v11  ;;  %648 = vmatpush2.xpose.msra.mxu0 %v559_v15  ;;  %v521_v11 = vld [vmem:[#allocation13 + $0x250] sm:$0xff]  ;;  %v515_v15 = vld [vmem:[#allocation13 + $0x220] sm:$0xff] }
  0xfb   :  { %649 = vmatprep.subr.mxu0 %v556_v17  ;;  %v394_v27 = vadd.f32 %v393_v20, %v392_v13  ;;  %v518_v13 = vld [vmem:[#allocation13 + $0x238] sm:$0xff]  ;;  %v512_v17 = vld [vmem:[#allocation13 + $0x208] sm:$0xff]  ;;  %v511_v20 = vld [vmem:[#allocation13 + $0x200] sm:$0xff] }
  0xfc   :  { %v358_v25 = vadd.f32 %v357_v18, %v356_v5  ;;  %v526_v5 = vld [vmem:[#allocation13 + $0x278] sm:$0xff]  ;;  %v517_v18 = vld [vmem:[#allocation13 + $0x230] sm:$0xff] }
  0xfd   :  { %719 = vmatpush2.xpose.msra.mxu1 %v561_v19  ;;  %v395_v34 = vrot.slane %v394_v27, 2  ;;  %v514_v19 = vld [vmem:[#allocation13 + $0x218] sm:$0xff] }
  0xfe   :  { %720 = vmatprep.subr.mxu1 %v558_v22  ;;  %650 = vmatpush2.xpose.msra.mxu0 %v555_v23  ;;  %v359_v32 = vrot.slane %v358_v25, 2  ;;  %v513_v22 = vld [vmem:[#allocation13 + $0x210] sm:$0xff]  ;;  %v960_v23 = vmov 1983009808  }
  0xff   :  { %651 = vmatprep.subr.mxu0 %v552_v24  ;;  %v396_v40 = vadd.f32 %v395_v34, %v394_v27  ;;  %v253_v24 = vunpack.c.l.s4 %v960_v23 }
 0x100   :  { %v360_v38 = vadd.f32 %v359_v32, %v358_v25 }
 0x101   :  { %721 = vmatpush2.xpose.msra.mxu1 %v557_v26  ;;  %v397_v43 = vrot.slane %v396_v40, 1  ;;  %v254_v26 = vunpack.c.0.s8 %v253_v24 }
 0x102   :  { %722 = vmatprep.subr.mxu1 %v554_v28  ;;  %652 = vmatpush2.xpose.msra.mxu0 %v551_v30  ;;  %v361_v42 = vrot.slane %v360_v38, 1 }
 0x103   :  { %653 = vmatprep.subr.mxu0 %v548_v31  ;;  %v398_v51 = vadd.f32 %v397_v43, %v396_v40  ;;  %v257_v32 = vsub.s32 %v254_v26, %v1022_v3 }
 0x104   :  { %v362_v49 = vadd.f32 %v361_v42, %v360_v38 }
 0x105   :  { %723 = vmatpush2.xpose.msra.mxu1 %v553_v33 }
 0x106   :  { %724 = vmatprep.subr.mxu1 %v550_v35  ;;  %654 = vmatpush2.xpose.msra.mxu0 %v547_v36 }
 0x107   :  { %655 = vmatprep.subr.mxu0 %v544_v37 }
 0x109   :  { %725 = vmatpush2.xpose.msra.mxu1 %v549_v39 }
 0x10a   :  { %726 = vmatprep.subr.mxu1 %v546_v41  ;;  %656 = vmatpush2.xpose.msra.mxu0 %v543_v21 }
 0x10b   :  { %657 = vmatprep.subr.mxu0 %v540_v45 }
 0x10d   :  { %727 = vmatpush2.xpose.msra.mxu1 %v545_v44 }
 0x10e   :  { %658 = vmatpush2.xpose.msra.mxu0 %v539_v50  ;;  %728 = vmatprep.subr.mxu1 %v542_v52 }
 0x10f   :  { %659 = vmatprep.subr.mxu0 %v536_v54 }
 0x111   :  { %729 = vmatpush2.xpose.msra.mxu1 %v541_v53 }
 0x112   :  { %660 = vmatpush2.xpose.msra.mxu0 %v535_v55  ;;  %730 = vmatprep.subr.mxu1 %v538_v56 }
 0x113   :  { %661 = vmatprep.subr.mxu0 %v532_v58 }
 0x115   :  { %731 = vmatpush2.xpose.msra.mxu1 %v537_v57 }
 0x116   :  { %662 = vmatpush2.xpose.msra.mxu0 %v531_v59  ;;  %732 = vmatprep.subr.mxu1 %v534_v60 }
 0x117   :  { %663 = vmatprep.subr.mxu0 %v528_v62  ;;  %v575_v62 = vld [vmem:[%s1136_s6] sm:$0x3] }
 0x119   :  { %733 = vmatpush2.xpose.msra.mxu1 %v533_v61 }
 0x11a   :  { %664 = vmatpush2.xpose.msra.mxu0 %v527_v63  ;;  %734 = vmatprep.subr.mxu1 %v530_v0  ;;  %v583_v63 = vsub.s32 1, %v1022_v3  ;;  %v580_v0 = vrot.slane %v575_v62, %v1031_v14 }
 0x11b   :  { %665 = vmatprep.subr.mxu0 %v524_v2 }
 0x11d   :  { %735 = vmatpush2.xpose.msra.mxu1 %v529_v1  ;;  %v584_v1 = vrot.slane %v575_v62, %v583_v63 }
 0x11e   :  { %666 = vmatpush2.xpose.msra.mxu0 %v523_v4  ;;  %736 = vmatprep.subr.mxu1 %v526_v5 }
 0x11f   :  { %667 = vmatprep.subr.mxu0 %v520_v7 }
 0x121   :  { %737 = vmatpush2.xpose.msra.mxu1 %v525_v6 }
 0x122   :  { %738 = vmatprep.subr.mxu1 %v522_v9  ;;  %668 = vmatpush2.xpose.msra.mxu0 %v519_v8 }
 0x123   :  { %669 = vmatprep.subr.mxu0 %v516_v10 }
 0x125   :  { %739 = vmatpush2.xpose.msra.mxu1 %v521_v11 }
 0x126   :  { %740 = vmatprep.subr.mxu1 %v518_v13  ;;  %670 = vmatpush2.xpose.msra.mxu0 %v515_v15 }
 0x127   :  { %s806_s13 = spop %805  ;;  %671 = vmatprep.subr.mxu0 %v512_v17 }
 0x128   :  { %s1099_s14 = smul.f32 0.001953125, %s806_s13  ;;  %s769_s13 = sshll.u32 %s961_s12, 4  ;;  %s770_s13 = int_to_ptr.vmem [resolvable:$true] %s769_s13 }
 0x129   :  { %741 = vmatpush2.xpose.msra.mxu1 %v517_v18  ;;  %p923_p12 = scmp.lt.s32.totalorder %s770_s13, %s770_s13 }
 0x12a   :  { %s231_s15 = smul.f32 %s1099_s14, %s1099_s14  ;;  %742 = vmatprep.subr.mxu1 %v514_v19  ;;  %672 = vmatpush2.xpose.msra.mxu0 %v511_v20 }
 0x12b   :  { %s808_s16 = spop %807 }
 0x12c   :  { %s230_s17 = smul.f32 0.001953125, %s808_s16 }
 0x12d   :  { %743 = vmatpush2.xpose.msra.mxu1 %v513_v22 }
 0x12e   :  { %s232_s18 = ssub.f32 %s230_s17, %s231_s15 }
 0x130   :  { %s234_s19 = sadd.f32 1e-05, %s232_s18 }
 0x132   :  { %v235_v29 = vstv %s234_s19 }
 0x133   :  { %830 = vrsqrt.f32 %v235_v29 }
 0x140   :  { %v831_v46 = vpop.eup %830 }
 0x141   :  { %809 = vpush %v831_v46 }
 0x142   :  { %811 = vpush %v362_v49 }
 0x143   :  { %813 = vpush %v398_v51 }
 0x172   :  { %s810_s21 = spop %809 }
 0x173   :  { %s238_s2 = smul.f32 %s810_s21, %s233_s0  ;;  %s812_s1 = spop %811 }
 0x174   :  { %s1103_s22 = smul.f32 0.001953125, %s812_s1  ;;  %s814_s23 = spop %813 }
 0x175   :  { %s240_s24 = smul.f32 %s238_s2, %s1099_s14  ;;  %v242_v25 = vstv %s238_s2  ;;  %s918_s14 = scalar_lea.vmem %s770_s13, 64 }
 0x176   :  { %s402_s4 = smul.f32 %s1103_s22, %s1103_s22  ;;  %v243_v27 = vmul.f32 %v242_v25, %v1042_v47  ;;  %v244_v28 = vmul.f32 %v242_v25, %v1044_v48  ;;  %p919_p11 = scmp.ne.s32.totalorder %s770_s13, %s918_s14 }
 0x177   :  { %s241_s25 = ssub.f32 %s239_s20, %s240_s24  ;;  %s401_s26 = smul.f32 0.001953125, %s814_s23 }
 0x178   :  { %p924_p13 = scmp.lt.s32.totalorder %s918_s14, %s918_s14 }
 0x179   :  { %v245_v29 = vstv %s241_s25  ;;  %s403_s27 = ssub.f32 %s401_s26, %s402_s4 }
 0x17a   :  { %v246_v30 = vadd.f32 %v245_v29, %v243_v27  ;;  %v247_v31 = vadd.f32 %v245_v29, %v244_v28  ;;  %p925_p0 = por %p924_p13, %p923_p12 }
 0x17b   :  { %s405_s28 = sadd.f32 1e-05, %s403_s27 }
 0x17c   :  { %v248_v33 = vmax.f32 %v246_v30, 0.0  ;;  %v249_v34 = vmax.f32 %v247_v31, 0.0  ;;  %p926_p1 = pnand %p925_p0, %p919_p11 }
 0x17d   :  { %v406_v35 = vstv %s405_s28 }
 0x17e   :  { %v265_v36 = vrot.slane %v249_v34, %v257_v32  ;;  %832 = vrsqrt.f32 %v406_v35  ;;  %v258_v37 = vrot.slane %v248_v33, %v257_v32 }
 0x180   :  { %v270_v38 = vrot.slane %v265_v36, 7 }
 0x182   :  { %v271_v47 = vsel %vm175_vm0, %v270_v38, %v258_v37 }
 0x183   :  { %v273_v48 = vsel %vm272_vm2, %v270_v38, %v271_v47 }
 0x184   :  { %v275_v39 = vsel %vm274_vm3, %v270_v38, %v273_v48 }
 0x185   :  { %v277_v40 = vsel %vm276_vm4, %v270_v38, %v275_v39 }
 0x186   :  { %279 = vst [vmem:[#allocation2] sm:$0xf] %v277_v40 }
 0x18b   :  { %v833_v41 = vpop.eup %832 }
 0x18c   :  { %815 = vpush %v833_v41 }
 0x1bd   :  { %s816_s8 = spop %815 }
 0x1be   :  { %s409_s3 = smul.f32 %s816_s8, %s802_s29 }
 0x1c0   :  { %s411_s5 = smul.f32 %s409_s3, %s1103_s22  ;;  %v413_v21 = vstv %s409_s3 }
 0x1c1   :  { %v414_v42 = vmul.f32 %v413_v21, %v1069_v12  ;;  %v415_v43 = vmul.f32 %v413_v21, %v1073_v16 }
 0x1c2   :  { %s412_s9 = ssub.f32 %s803_s30, %s411_s5 }
 0x1c4   :  { %v416_v44 = vstv %s412_s9 }
 0x1c5   :  { %v417_v45 = vadd.f32 %v416_v44, %v414_v42  ;;  %v418_v46 = vadd.f32 %v416_v44, %v415_v43 }
 0x1c7   :  { %v419_v49 = vmax.f32 %v417_v45, 0.0  ;;  %v420_v50 = vmax.f32 %v418_v46, 0.0 }
 0x1c9   :  { %v436_v51 = vrot.slane %v420_v50, %v257_v32  ;;  %v429_v52 = vrot.slane %v419_v49, %v257_v32 }
 0x1cb   :  { %v439_v53 = vrot.slane %v436_v51, 7 }
 0x1cd   :  { %v440_v54 = vsel %vm175_vm0, %v439_v53, %v429_v52 }
 0x1ce   :  { %v441_v55 = vsel %vm272_vm2, %v439_v53, %v440_v54 }
 0x1cf   :  { %v442_v56 = vsel %vm274_vm3, %v439_v53, %v441_v55 }
 0x1d0   :  { %v443_v57 = vsel %vm276_vm4, %v439_v53, %v442_v56 }
 0x1d1   :  { %445 = vst [vmem:[#allocation2 + $0x4] sm:$0xf] %v443_v57 }
 0x1d8   :  { %v446_v12 = vld [vmem:[#allocation2] sm:$0xff] }
 0x1d9   :  { %v595_v58 = vrot.slane %v446_v12, %v257_v32  ;;  %v588_v16 = vcombine.high %v446_v12, %v446_v12 }
 0x1db   :  { %v603_v59 = vcombine.high %v595_v58, %v595_v58  ;;  %v602_v60 = vrot.slane %v588_v16, %v257_v32 }
 0x1dd   :  { %673 = vmatprep.mubr.f32.mxu0 %v603_v59  ;;  %v604_v61 = vcombine.high %v602_v60, %v602_v60 }
 0x1de   :  { %674 = vmatmul.mubr.f32.vlgmr.msra.gmra.mxu0 %v595_v58 }
 0x1df   :  { %744 = vmatprep.mubr.f32.mxu1 %v604_v61 }
 0x1e0   :  { %745 = vmatmul.mubr.f32.vlgmr.msra.gmra.mxu1 %v602_v60 }
 0x29e   :  { %v675_v2 = vpop.f32.mrf.mxu0 }
 0x29f   :  { %v676_v4 = vadd.f32 %v675_v2, %v580_v0 }
 0x2a0   :  { %v677_v5 = vpop.f32.mrf.mxu0  ;;  %v746_v6 = vpop.f32.mrf.mxu1 }
 0x2a1   :  { %v678_v7 = vadd.f32 %v677_v5, %v584_v1  ;;  %v747_v9 = vadd.f32 %v746_v6, %v676_v4 }
 0x2a2   :  { %v748_v8 = vpop.f32.mrf.mxu1 }
 0x2a3   :  { %v749_v10 = vadd.f32 %v748_v8, %v678_v7 }
 0x2a5   :  { %v753_v11 = vcombine.low %v747_v9, %v749_v10 }
 0x2a7   :  { %804 = vst.sshfl [vmem:[#allocation15] sm:$0x33 pattern:$0x76325410] %v753_v11 }
 0x2a8   :  { %929 = shalt.err (!%p926_p1)
}
 0x2a9   :  { %772 = dma.vmem_to_hbm [thread:$0]  %s770_s13, 64, %s1137_s7, [#allocation5]  }
 0x2aa   :  { %948 = dma.done.wait [#allocation5], 64  }
 0x2ab   :  { %949 = vsyncadd [#allocation5], 4294967232 }
 0x2ac   :  { %776 = vsyncpa [#allocation4], 1 }
 0x2ad   :  { %777 = vsyncpa [#allocation14], 1 }
 0x2ae   :  { %778 = vsyncpa [#allocation5], 1 }
 0x2af   :  { %779 = vsyncpa [#allocation6], 1 }
 0x2b0   :  { %780 = vsyncpa [#allocation7], 1 }
 0x2b1   :  { %781 = vsyncpa [#allocation11], 1 }

</bundles_post_ra>
